<compile_context>
chip_gen: v7x
topology: tpu7x:2x2x1
jax: 0.10.0
libtpu: 0.0.40
codegen_flags: <defaults>
</compile_context>

<pallas_src>
import jax
import jax.numpy as jnp
from jax.experimental import pallas as pl
from jax.experimental.pallas import tpu as pltpu


_SMALL_BYPASS_BYTES = 1 << 20   # below this, kernel dispatch overhead dominates
_MAX_DMA_CHUNKS = 4             # concurrent outstanding HBM->HBM DMAs
_DMA_CHUNK_ALIGN = 1024         # elements; keeps chunk boundaries DMA-friendly


def _identity_alias_kernel(x_ref, o_ref):
    # Output aliases the input HBM buffer (input_output_aliases={0: 0}); the
    # data is already where it needs to be, so the body is a no-op:
    # zero HBM traffic, zero VMEM, zero per-step overhead.
    del x_ref, o_ref


def _dma_chunks(total_elems):
    """Static (start, size) chunk list covering [0, total_elems)."""
    n = max(1, min(_MAX_DMA_CHUNKS, pl.cdiv(total_elems, _DMA_CHUNK_ALIGN)))
    base = pl.cdiv(total_elems, n)
    base = pl.cdiv(base, _DMA_CHUNK_ALIGN) * _DMA_CHUNK_ALIGN
    chunks = []
    start = 0
    while start < total_elems:
        size = min(base, total_elems - start)
        chunks.append((start, size))
        start += size
    return chunks


def _make_hbm_copy_kernel(chunks):
    """Direct HBM->HBM chunked DMA copy (no VMEM staging, no vld/vst)."""

    def kernel(x_ref, o_ref, sems):
        copies = []
        # Issue all chunk DMAs back-to-back so they are in flight concurrently.
        for k, (start, size) in enumerate(chunks):
            cp = pltpu.make_async_copy(
                x_ref.at[start:start + size],
                o_ref.at[start:start + size],
                sems.at[k],
            )
            cp.start()
            copies.append(cp)
        # Drain.
        for cp in copies:
            cp.wait()

    return kernel


def feature_processor_forward(x, *, materialize=False,
                              min_pallas_bytes=_SMALL_BYPASS_BYTES):
    """Reproduces FeatureProcessor.forward(x) == x exactly (shape & dtype).

    Default: zero-copy aliased identity kernel.
    materialize=True: a real, freshly materialized copy via HBM->HBM DMA.
    Inputs smaller than `min_pallas_bytes` skip the kernel entirely.
    """
    total = x.size
    if total == 0:
        return x  # nothing to do for empty tensors

    nbytes = total * jnp.dtype(x.dtype).itemsize
    if nbytes < min_pallas_bytes:
        # Tiny feature maps: pallas_call dispatch + DMA setup would dominate.
        return x

    if not materialize:
        # Zero-traffic identity: output buffer aliases the input buffer.
        return pl.pallas_call(
            _identity_alias_kernel,
            out_shape=jax.ShapeDtypeStruct(x.shape, x.dtype),
            in_specs=[pl.BlockSpec(memory_space=pl.ANY)],
            out_specs=pl.BlockSpec(memory_space=pl.ANY),
            input_output_aliases={0: 0},
        )(x)

    # Materialized copy: flatten to 1-D (free for a contiguous array) and
    # issue a handful of overlapping HBM->HBM DMAs.  Works for any shape,
    # dtype and element count; never touches VMEM so it is equally safe on
    # v5e/v6e (128 MiB) and v7x (64 MiB per TC).
    chunks = _dma_chunks(total)
    x_flat = x.reshape(total)
    out_flat = pl.pallas_call(
        _make_hbm_copy_kernel(chunks),
        out_shape=jax.ShapeDtypeStruct((total,), x.dtype),
        in_specs=[pl.BlockSpec(memory_space=pl.ANY)],
        out_specs=pl.BlockSpec(memory_space=pl.ANY),
        scratch_shapes=[pltpu.SemaphoreType.DMA((len(chunks),))],
        cost_estimate=pl.CostEstimate(
            flops=0, transcendentals=0, bytes_accessed=2 * nbytes),
    )(x_flat)
    return out_flat.reshape(x.shape)


if __name__ == "__main__":
    key = jax.random.PRNGKey(0)
    # NCHW feature-map-like input: batch=2, channels=4, 16x16 spatial.
    x = jax.random.normal(key, (2, 4, 16, 16), dtype=jnp.float32)

    # Path 1: zero-copy aliased identity kernel (force past small-input bypass).
    y_alias = jax.block_until_ready(
        feature_processor_forward(x, min_pallas_bytes=0))

    # Path 2: materialized copy via direct HBM->HBM chunked DMA.
    y_copy = jax.block_until_ready(
        feature_processor_forward(x, materialize=True, min_pallas_bytes=0))

    # Path 3: default small-input bypass (no kernel dispatch for an 8 KiB tensor).
    y_bypass = jax.block_until_ready(feature_processor_forward(x))

    # Path 4: odd element count (not a multiple of 128 or 8) through the DMA
    # copy path — the shape-degenerate branches of the previous version are gone.
    x_odd = jax.random.normal(jax.random.PRNGKey(0), (3, 5, 26), dtype=jnp.float32)
    y_odd = jax.block_until_ready(
        feature_processor_forward(x_odd, materialize=True, min_pallas_bytes=0))

    for y, ref in ((y_alias, x), (y_copy, x), (y_bypass, x), (y_odd, x_odd)):
        assert y.shape == ref.shape, (y.shape, ref.shape)
        assert y.dtype == ref.dtype, (y.dtype, ref.dtype)
        assert bool(jnp.all(y == ref)), "identity kernel mismatch"

    print("KERNEL_OK")
</pallas_src>

<mosaic_0001>
module attributes {stable_mosaic.version = 11 : i64} {
  func.func @_identity_alias_kernel(%arg0: memref<2x4x16x16xf32, #tpu.memory_space<any>>, %arg1: memref<2x4x16x16xf32, #tpu.memory_space<any>>) attributes {dimension_semantics = [], scalar_prefetch = 0 : i64, scratch_operands = 0 : i64, tpu.core_type = #tpu.core_type<tc>} {
    return
  }
}

</mosaic_0001>

<bundles_post_ra>
// kernel: tpu_custom_call.1
= control target key start
LH: loop header
LB: loop body
LE: loop exit
PB: predicated region body
PF: predicated region fallthrough
CT: control target
= control target key end

     0   :  { %s16_s0 = inlined_call_operand.hbm [shape: f32[2,4,16,16], index: 0, kind: input, shape index: {}, may-alias: {0,1}]   ;;  %s17_s1 = inlined_call_operand.hbm [shape: f32[2,4,16,16], index: 1, kind: output, shape index: {}, may-alias: {0,1}]  }

</bundles_post_ra>
